<compile_context>
chip_gen: v7x
topology: tpu7x:2x2x1
jax: 0.10.0
libtpu: 0.0.40
codegen_flags: <defaults>
</compile_context>

<pallas_src>
import math
import jax
import jax.numpy as jnp
from jax.experimental import pallas as pl
from jax.experimental.pallas import tpu as pltpu


# ----------------------------- config (stand-in for cfg.*) -----------------------------
INPUT_FEAT_DIM = 4
NUM_FG_CLASSES = 4           # -> num_pred_classes = 5
NUM_LEVELS = 4
FP_FEATURE_DIM = 32
PREDICTION_HEAD_LEVELS = [0, 1]
MAX_POINTS = 512

NUM_PRED_CLASSES = NUM_FG_CLASSES + 1
HEAD_COUT = NUM_PRED_CLASSES + 1 + 3 + 3   # cls + ctr + offset + size_log = 12
HEAD_COUT_PAD = 16                         # sublane-aligned (multiple of 8)


# ----------------------------- Pallas kernel (hot path) -----------------------------
def _make_head_kernel(level_shapes, cout_pad, n_max):
    """Build the fused multi-level 1x1-conv head kernel.

    level_shapes: tuple of (B, C, N) per prediction-head level (static).
    Kernel args:  w_ref [L, cout_pad, C], b_ref [L, cout_pad, 1],
                  x_ref_0 [B, C, N0], ..., o_ref [1, B, cout_pad, n_max] (block).
    """
    def kernel(w_ref, b_ref, *refs):
        x_refs = refs[:-1]
        o_ref = refs[-1]
        lvl = pl.program_id(0)
        for l, (B, _, N) in enumerate(level_shapes):
            @pl.when(lvl == l)
            def _(l=l, B=B, N=N):
                w = w_ref[l]          # (cout_pad, C)  static index -> resident VMEM read
                b = b_ref[l]          # (cout_pad, 1)
                x = x_refs[l]         # (B, C, N)
                for bi in range(B):
                    y = jnp.dot(w, x[bi], preferred_element_type=jnp.float32) + b
                    o_ref[0, bi, :, :N] = y
                    if N < n_max:     # deterministic padded tail (sliced off by caller)
                        o_ref[0, bi, :, N:] = jnp.zeros((cout_pad, n_max - N), jnp.float32)
    return kernel


def fused_head_conv1x1_multilevel(features_list, w_stack, b_stack):
    """Fused 1x1 Conv1d for all head branches of ALL prediction levels, one launch.

    features_list: list (length L) of [B, C, N_l] float32 (same B and C per level;
                   N_l must be a multiple of 128 for unmasked lane stores — true here).
    w_stack:       [L, Cout_pad, C] float32 (per-level concat of branch weights, zero-padded rows)
    b_stack:       [L, Cout_pad, 1] float32
    returns:       packed [L, B, Cout_pad, N_max] float32, plus the static level shapes.
    """
    L = len(features_list)
    assert L == w_stack.shape[0] == b_stack.shape[0]
    cout_pad = int(w_stack.shape[1])
    C = int(features_list[0].shape[1])

    level_shapes = []
    for feats in features_list:
        B, C_l, N = (int(s) for s in feats.shape)
        # NOTE: works for PREDICTION_HEAD_LEVELS=[0,1] (C=32). Levels 2/3 of the real
        # model have C=256; grouping by channel count would be needed to add them.
        assert C_l == C, "fused head path requires identical channel count per level"
        level_shapes.append((B, C_l, N))
    B = level_shapes[0][0]
    assert all(b == B for (b, _, _) in level_shapes)
    n_max = max(n for (_, _, n) in level_shapes)

    # Full-array (resident) input specs: weights/bias + every level's features.
    in_specs = [
        pl.BlockSpec(tuple(w_stack.shape), lambda l: (0, 0, 0)),
        pl.BlockSpec(tuple(b_stack.shape), lambda l: (0, 0, 0)),
    ]
    for shp in level_shapes:
        in_specs.append(pl.BlockSpec(shp, lambda l: (0, 0, 0)))

    # One output block per level -> grid step l owns block l (safe under "parallel").
    out_specs = pl.BlockSpec((1, B, cout_pad, n_max), lambda l: (l, 0, 0, 0))

    flops = sum(2 * b * n * c * cout_pad for (b, c, n) in level_shapes)
    bytes_in = (sum(b * c * n for (b, c, n) in level_shapes)
                + w_stack.size + b_stack.size) * 4
    bytes_out = L * B * cout_pad * n_max * 4
    cost = pl.CostEstimate(flops=flops, transcendentals=0,
                           bytes_accessed=bytes_in + bytes_out)

    packed = pl.pallas_call(
        _make_head_kernel(tuple(level_shapes), cout_pad, n_max),
        out_shape=jax.ShapeDtypeStruct((L, B, cout_pad, n_max), jnp.float32),
        grid=(L,),
        in_specs=in_specs,
        out_specs=out_specs,
        compiler_params=pltpu.CompilerParams(dimension_semantics=("parallel",)),
        cost_estimate=cost,
    )(w_stack, b_stack, *features_list)

    return packed, level_shapes


# ----------------------------- parameter construction -----------------------------
def init_head_params(key, in_channels, num_pred_classes):
    """FCAF3DHead params, exactly matching the module's shapes + bias init values."""
    k_cls, k_ctr, k_off, k_siz, k_bctr = jax.random.split(key, 5)
    bound = 1.0 / math.sqrt(in_channels)

    w_cls = jax.random.uniform(k_cls, (num_pred_classes, in_channels), jnp.float32, -bound, bound)
    w_ctr = jax.random.uniform(k_ctr, (1, in_channels), jnp.float32, -bound, bound)
    w_off = jax.random.uniform(k_off, (3, in_channels), jnp.float32, -bound, bound)
    w_siz = jax.random.uniform(k_siz, (3, in_channels), jnp.float32, -bound, bound)

    b_cls = jnp.full((num_pred_classes,), -math.log((1.0 - 0.01) / 0.01), jnp.float32)
    b_ctr = jax.random.uniform(k_bctr, (1,), jnp.float32, -bound, bound)  # default conv bias init
    b_off = jnp.zeros((3,), jnp.float32)
    b_siz = jnp.full((3,), -2.3, jnp.float32)

    w_all = jnp.concatenate([w_cls, w_ctr, w_off, w_siz], axis=0)            # (12, C)
    b_all = jnp.concatenate([b_cls, b_ctr, b_off, b_siz], axis=0)[:, None]   # (12, 1)
    return w_all, b_all


def stack_and_pad_head_params(head_params, cout_pad):
    """Pad Cout 12->cout_pad with zero rows and stack per level. Done ONCE at init time."""
    ws, bs = [], []
    for (w, b) in head_params:
        pad = cout_pad - w.shape[0]
        ws.append(jnp.pad(w, ((0, pad), (0, 0))))
        bs.append(jnp.pad(b, ((0, pad), (0, 0))))
    return jnp.stack(ws, axis=0), jnp.stack(bs, axis=0)   # [L,cout_pad,C], [L,cout_pad,1]


def split_head_outputs_packed(packed, level_shapes, num_pred_classes):
    """Slice the packed [L,B,Cout_pad,N_max] slab into per-level branch outputs."""
    c = num_pred_classes
    all_cls, all_ctr, all_off, all_siz = [], [], [], []
    for l, (_, _, N) in enumerate(level_shapes):
        lvl = packed[l]                              # (B, Cout_pad, N_max)
        all_cls.append(lvl[:, :c, :N])
        all_ctr.append(lvl[:, c:c + 1, :N])
        all_off.append(lvl[:, c + 1:c + 4, :N])
        all_siz.append(lvl[:, c + 4:c + 7, :N])
    return all_cls, all_ctr, all_off, all_siz


# ----------------------------- FCAF3D forward (head path) -----------------------------
def fcaf3d_forward(fp_features, w_stack, b_stack, pred_head_levels, num_pred_classes):
    """
    fp_features: list of per-level features [B, C_l, N_l] ordered as the reference
                 `end_points['fp_features'][::-1]` (level 0 = finest, full N).
    w_stack/b_stack: stacked, Cout-padded head params [L, Cout_pad, C] / [L, Cout_pad, 1].
    Returns dict mirroring FCAF3D.forward outputs for the prediction-head path.
    """
    end_points = {"fp_features": fp_features[::-1]}  # stored coarse-first as in reference

    level_feats = [end_points["fp_features"][::-1][lvl] for lvl in pred_head_levels]
    packed, level_shapes = fused_head_conv1x1_multilevel(level_feats, w_stack, b_stack)

    cls_p, ctr_p, off_p, siz_p = split_head_outputs_packed(packed, level_shapes, num_pred_classes)
    end_points["cls_preds"] = cls_p
    end_points["ctr_preds"] = ctr_p
    end_points["center_offset_preds"] = off_p
    end_points["size_log_preds"] = siz_p
    return end_points


# ----------------------------- main -----------------------------
if __name__ == "__main__":
    key = jax.random.PRNGKey(0)
    B = 2

    # Per-level feature channels/point-counts matching the module's bookkeeping:
    # fp_out_channels (after .reverse()) = [FP, FP, FP, 256];
    # point counts at those levels: [MAX_POINTS, MAX_POINTS/2, MAX_POINTS/4, MAX_POINTS/8].
    level_channels = [FP_FEATURE_DIM, FP_FEATURE_DIM, FP_FEATURE_DIM, 256]
    level_npoints = [MAX_POINTS, MAX_POINTS // 2, MAX_POINTS // 4, MAX_POINTS // 8]

    # TODO(synk): these stand in for PointNet++ backbone outputs (source not provided).
    fp_features = []
    for lvl in range(NUM_LEVELS):
        key, sub = jax.random.split(key)
        fp_features.append(
            jax.random.normal(sub, (B, level_channels[lvl], level_npoints[lvl]), jnp.float32))

    # One FCAF3DHead per entry of PREDICTION_HEAD_LEVELS (true, unpadded params)...
    head_params = []
    for lvl in PREDICTION_HEAD_LEVELS:
        key, sub = jax.random.split(key)
        head_params.append(init_head_params(sub, level_channels[lvl], NUM_PRED_CLASSES))
    # ...stacked + Cout-padded once, up front, so the forward path has no extra XLA ops.
    w_stack, b_stack = stack_and_pad_head_params(head_params, HEAD_COUT_PAD)

    end_points = fcaf3d_forward(fp_features, w_stack, b_stack,
                                PREDICTION_HEAD_LEVELS, NUM_PRED_CLASSES)
    jax.block_until_ready(end_points["cls_preds"])

    # Lightweight correctness check vs. plain-JAX reference of the 1x1 convs
    # (uses the original unpadded per-level weights).
    for i, lvl in enumerate(PREDICTION_HEAD_LEVELS):
        feats = fp_features[lvl]
        w_all, b_all = head_params[i]
        ref = jnp.einsum("oc,bcn->bon", w_all, feats) + b_all[None, :, :]
        c = NUM_PRED_CLASSES
        ref_cls = ref[:, :c, :]
        ref_ctr = ref[:, c:c + 1, :]
        ref_off = ref[:, c + 1:c + 4, :]
        ref_siz = ref[:, c + 4:c + 7, :]
        assert jnp.allclose(end_points["cls_preds"][i], ref_cls, atol=1e-4)
        assert jnp.allclose(end_points["ctr_preds"][i], ref_ctr, atol=1e-4)
        assert jnp.allclose(end_points["center_offset_preds"][i], ref_off, atol=1e-4)
        assert jnp.allclose(end_points["size_log_preds"][i], ref_siz, atol=1e-4)

    print("KERNEL_OK")
</pallas_src>

<mosaic_0001>
module attributes {stable_mosaic.version = 11 : i64} {
  func.func @kernel(%arg0: i32, %arg1: memref<2x16x32xf32, #tpu.memory_space<vmem>>, %arg2: memref<2x16x1xf32, #tpu.memory_space<vmem>>, %arg3: memref<2x32x512xf32, #tpu.memory_space<vmem>>, %arg4: memref<2x32x256xf32, #tpu.memory_space<vmem>>, %arg5: memref<1x2x16x512xf32, #tpu.memory_space<vmem>>) attributes {dimension_semantics = [#tpu.dimension_semantics<parallel>], iteration_bounds = array<i64: 2>, scalar_prefetch = 0 : i64, scratch_operands = 0 : i64, tpu.core_type = #tpu.core_type<tc>, window_params = [{pipeline_mode = #tpu.pipeline_mode<synchronous>, transform_indices = @transform_0, window_bounds = array<i64: 2, 16, 32>}, {pipeline_mode = #tpu.pipeline_mode<synchronous>, transform_indices = @transform_1, window_bounds = array<i64: 2, 16, 1>}, {pipeline_mode = #tpu.pipeline_mode<synchronous>, transform_indices = @transform_2, window_bounds = array<i64: 2, 32, 512>}, {pipeline_mode = #tpu.pipeline_mode<synchronous>, transform_indices = @transform_3, window_bounds = array<i64: 2, 32, 256>}, {transform_indices = @transform_4, window_bounds = array<i64: 1, 2, 16, 512>}]} {
    %c0_i32 = arith.constant 0 : i32
    %0 = arith.cmpi eq, %arg0, %c0_i32 : i32
    %1 = arith.extui %0 : i1 to i32
    %c0_i32_0 = arith.constant 0 : i32
    %2 = arith.cmpi ne, %1, %c0_i32_0 : i32
    scf.if %2 {
      %c0 = arith.constant 0 : index
      %c0_2 = arith.constant 0 : index
      %c0_3 = arith.constant 0 : index
      %6 = vector.load %arg1[%c0, %c0_2, %c0_3] : memref<2x16x32xf32, #tpu.memory_space<vmem>>, vector<1x16x32xf32>
      %7 = vector.shape_cast %6 : vector<1x16x32xf32> to vector<16x32xf32>
      %c0_4 = arith.constant 0 : index
      %c0_5 = arith.constant 0 : index
      %c0_6 = arith.constant 0 : index
      %8 = vector.load %arg2[%c0_4, %c0_5, %c0_6] : memref<2x16x1xf32, #tpu.memory_space<vmem>>, vector<1x16x1xf32>
      %9 = vector.shape_cast %8 : vector<1x16x1xf32> to vector<16x1xf32>
      %c0_7 = arith.constant 0 : index
      %c0_8 = arith.constant 0 : index
      %c0_9 = arith.constant 0 : index
      %10 = vector.load %arg3[%c0_7, %c0_8, %c0_9] : memref<2x32x512xf32, #tpu.memory_space<vmem>>, vector<1x32x512xf32>
      %11 = vector.shape_cast %10 : vector<1x32x512xf32> to vector<32x512xf32>
      %cst = arith.constant dense<0.000000e+00> : vector<16x512xf32>
      %12 = tpu.matmul %7, %11, %cst {dimension_numbers = #tpu.dot_dimension_numbers<[1], [0], [0], [1], [0, 0, 1, 1], [], []>} : vector<16x32xf32>, vector<32x512xf32>, vector<16x512xf32> -> vector<16x512xf32>
      %13 = vector.broadcast %9 : vector<16x1xf32> to vector<16x512xf32>
      %14 = arith.addf %12, %13 : vector<16x512xf32>
      %c0_10 = arith.constant 0 : index
      %c0_11 = arith.constant 0 : index
      %c0_12 = arith.constant 0 : index
      %c0_13 = arith.constant 0 : index
      %15 = vector.load %arg5[%c0_10, %c0_11, %c0_12, %c0_13] : memref<1x2x16x512xf32, #tpu.memory_space<vmem>>, vector<1x1x16x512xf32>
      %16 = vector.shape_cast %15 : vector<1x1x16x512xf32> to vector<16x512xf32>
      %17 = vector.shape_cast %14 : vector<16x512xf32> to vector<1x1x16x512xf32>
      tpu.vector_store %arg5[%c0_10, %c0_11, %c0_12, %c0_13], %17 {strides = array<i32>} : memref<1x2x16x512xf32, #tpu.memory_space<vmem>>, vector<1x1x16x512xf32>,
      %c1 = arith.constant 1 : index
      %c0_14 = arith.constant 0 : index
      %c0_15 = arith.constant 0 : index
      %18 = vector.load %arg3[%c1, %c0_14, %c0_15] : memref<2x32x512xf32, #tpu.memory_space<vmem>>, vector<1x32x512xf32>
      %19 = vector.shape_cast %18 : vector<1x32x512xf32> to vector<32x512xf32>
      %cst_16 = arith.constant dense<0.000000e+00> : vector<16x512xf32>
      %20 = tpu.matmul %7, %19, %cst_16 {dimension_numbers = #tpu.dot_dimension_numbers<[1], [0], [0], [1], [0, 0, 1, 1], [], []>} : vector<16x32xf32>, vector<32x512xf32>, vector<16x512xf32> -> vector<16x512xf32>
      %21 = vector.broadcast %9 : vector<16x1xf32> to vector<16x512xf32>
      %22 = arith.addf %20, %21 : vector<16x512xf32>
      %c0_17 = arith.constant 0 : index
      %c1_18 = arith.constant 1 : index
      %c0_19 = arith.constant 0 : index
      %c0_20 = arith.constant 0 : index
      %23 = vector.load %arg5[%c0_17, %c1_18, %c0_19, %c0_20] : memref<1x2x16x512xf32, #tpu.memory_space<vmem>>, vector<1x1x16x512xf32>
      %24 = vector.shape_cast %23 : vector<1x1x16x512xf32> to vector<16x512xf32>
      %25 = vector.shape_cast %22 : vector<16x512xf32> to vector<1x1x16x512xf32>
      tpu.vector_store %arg5[%c0_17, %c1_18, %c0_19, %c0_20], %25 {strides = array<i32>} : memref<1x2x16x512xf32, #tpu.memory_space<vmem>>, vector<1x1x16x512xf32>,
    } else {
    }
    %c1_i32 = arith.constant 1 : i32
    %3 = arith.cmpi eq, %arg0, %c1_i32 : i32
    %4 = arith.extui %3 : i1 to i32
    %c0_i32_1 = arith.constant 0 : i32
    %5 = arith.cmpi ne, %4, %c0_i32_1 : i32
    scf.if %5 {
      %c1 = arith.constant 1 : index
      %c0 = arith.constant 0 : index
      %c0_2 = arith.constant 0 : index
      %6 = vector.load %arg1[%c1, %c0, %c0_2] : memref<2x16x32xf32, #tpu.memory_space<vmem>>, vector<1x16x32xf32>
      %7 = vector.shape_cast %6 : vector<1x16x32xf32> to vector<16x32xf32>
      %c1_3 = arith.constant 1 : index
      %c0_4 = arith.constant 0 : index
      %c0_5 = arith.constant 0 : index
      %8 = vector.load %arg2[%c1_3, %c0_4, %c0_5] : memref<2x16x1xf32, #tpu.memory_space<vmem>>, vector<1x16x1xf32>
      %9 = vector.shape_cast %8 : vector<1x16x1xf32> to vector<16x1xf32>
      %c0_6 = arith.constant 0 : index
      %c0_7 = arith.constant 0 : index
      %c0_8 = arith.constant 0 : index
      %10 = vector.load %arg4[%c0_6, %c0_7, %c0_8] : memref<2x32x256xf32, #tpu.memory_space<vmem>>, vector<1x32x256xf32>
      %11 = vector.shape_cast %10 : vector<1x32x256xf32> to vector<32x256xf32>
      %cst = arith.constant dense<0.000000e+00> : vector<16x256xf32>
      %12 = tpu.matmul %7, %11, %cst {dimension_numbers = #tpu.dot_dimension_numbers<[1], [0], [0], [1], [0, 0, 1, 1], [], []>} : vector<16x32xf32>, vector<32x256xf32>, vector<16x256xf32> -> vector<16x256xf32>
      %13 = vector.broadcast %9 : vector<16x1xf32> to vector<16x256xf32>
      %14 = arith.addf %12, %13 : vector<16x256xf32>
      %c0_9 = arith.constant 0 : index
      %c0_10 = arith.constant 0 : index
      %c0_11 = arith.constant 0 : index
      %c0_12 = arith.constant 0 : index
      %15 = vector.load %arg5[%c0_9, %c0_10, %c0_11, %c0_12] : memref<1x2x16x512xf32, #tpu.memory_space<vmem>>, vector<1x1x16x256xf32>
      %16 = vector.shape_cast %15 : vector<1x1x16x256xf32> to vector<16x256xf32>
      %17 = vector.shape_cast %14 : vector<16x256xf32> to vector<1x1x16x256xf32>
      tpu.vector_store %arg5[%c0_9, %c0_10, %c0_11, %c0_12], %17 {strides = array<i32>} : memref<1x2x16x512xf32, #tpu.memory_space<vmem>>, vector<1x1x16x256xf32>,
      %cst_13 = arith.constant 0.000000e+00 : f32
      %18 = vector.broadcast %cst_13 : f32 to vector<16x256xf32>
      %c0_14 = arith.constant 0 : index
      %c0_15 = arith.constant 0 : index
      %c0_16 = arith.constant 0 : index
      %c256 = arith.constant 256 : index
      %19 = vector.load %arg5[%c0_14, %c0_15, %c0_16, %c256] : memref<1x2x16x512xf32, #tpu.memory_space<vmem>>, vector<1x1x16x256xf32>
      %20 = vector.shape_cast %19 : vector<1x1x16x256xf32> to vector<16x256xf32>
      %21 = vector.shape_cast %18 : vector<16x256xf32> to vector<1x1x16x256xf32>
      tpu.vector_store %arg5[%c0_14, %c0_15, %c0_16, %c256], %21 {strides = array<i32>} : memref<1x2x16x512xf32, #tpu.memory_space<vmem>>, vector<1x1x16x256xf32>,
      %c1_17 = arith.constant 1 : index
      %c0_18 = arith.constant 0 : index
      %c0_19 = arith.constant 0 : index
      %22 = vector.load %arg4[%c1_17, %c0_18, %c0_19] : memref<2x32x256xf32, #tpu.memory_space<vmem>>, vector<1x32x256xf32>
      %23 = vector.shape_cast %22 : vector<1x32x256xf32> to vector<32x256xf32>
      %cst_20 = arith.constant dense<0.000000e+00> : vector<16x256xf32>
      %24 = tpu.matmul %7, %23, %cst_20 {dimension_numbers = #tpu.dot_dimension_numbers<[1], [0], [0], [1], [0, 0, 1, 1], [], []>} : vector<16x32xf32>, vector<32x256xf32>, vector<16x256xf32> -> vector<16x256xf32>
      %25 = vector.broadcast %9 : vector<16x1xf32> to vector<16x256xf32>
      %26 = arith.addf %24, %25 : vector<16x256xf32>
      %c0_21 = arith.constant 0 : index
      %c1_22 = arith.constant 1 : index
      %c0_23 = arith.constant 0 : index
      %c0_24 = arith.constant 0 : index
      %27 = vector.load %arg5[%c0_21, %c1_22, %c0_23, %c0_24] : memref<1x2x16x512xf32, #tpu.memory_space<vmem>>, vector<1x1x16x256xf32>
      %28 = vector.shape_cast %27 : vector<1x1x16x256xf32> to vector<16x256xf32>
      %29 = vector.shape_cast %26 : vector<16x256xf32> to vector<1x1x16x256xf32>
      tpu.vector_store %arg5[%c0_21, %c1_22, %c0_23, %c0_24], %29 {strides = array<i32>} : memref<1x2x16x512xf32, #tpu.memory_space<vmem>>, vector<1x1x16x256xf32>,
      %cst_25 = arith.constant 0.000000e+00 : f32
      %30 = vector.broadcast %cst_25 : f32 to vector<16x256xf32>
      %c0_26 = arith.constant 0 : index
      %c1_27 = arith.constant 1 : index
      %c0_28 = arith.constant 0 : index
      %c256_29 = arith.constant 256 : index
      %31 = vector.load %arg5[%c0_26, %c1_27, %c0_28, %c256_29] : memref<1x2x16x512xf32, #tpu.memory_space<vmem>>, vector<1x1x16x256xf32>
      %32 = vector.shape_cast %31 : vector<1x1x16x256xf32> to vector<16x256xf32>
      %33 = vector.shape_cast %30 : vector<16x256xf32> to vector<1x1x16x256xf32>
      tpu.vector_store %arg5[%c0_26, %c1_27, %c0_28, %c256_29], %33 {strides = array<i32>} : memref<1x2x16x512xf32, #tpu.memory_space<vmem>>, vector<1x1x16x256xf32>,
    } else {
    }
    return
  }
  func.func @transform_0(%arg0: i32) -> (i32, i32, i32) {
    %c0_i32 = arith.constant 0 : i32
    %c0_i32_0 = arith.constant 0 : i32
    %c0_i32_1 = arith.constant 0 : i32
    %c0_i32_2 = arith.constant 0 : i32
    return %c0_i32, %c0_i32_0, %c0_i32_1 : i32, i32, i32
  }
  func.func @transform_1(%arg0: i32) -> (i32, i32, i32) {
    %c0_i32 = arith.constant 0 : i32
    %c0_i32_0 = arith.constant 0 : i32
    %c0_i32_1 = arith.constant 0 : i32
    %c0_i32_2 = arith.constant 0 : i32
    return %c0_i32, %c0_i32_0, %c0_i32_1 : i32, i32, i32
  }
  func.func @transform_2(%arg0: i32) -> (i32, i32, i32) {
    %c0_i32 = arith.constant 0 : i32
    %c0_i32_0 = arith.constant 0 : i32
    %c0_i32_1 = arith.constant 0 : i32
    %c0_i32_2 = arith.constant 0 : i32
    return %c0_i32, %c0_i32_0, %c0_i32_1 : i32, i32, i32
  }
  func.func @transform_3(%arg0: i32) -> (i32, i32, i32) {
    %c0_i32 = arith.constant 0 : i32
    %c0_i32_0 = arith.constant 0 : i32
    %c0_i32_1 = arith.constant 0 : i32
    %c0_i32_2 = arith.constant 0 : i32
    return %c0_i32, %c0_i32_0, %c0_i32_1 : i32, i32, i32
  }
  func.func @transform_4(%arg0: i32) -> (i32, i32, i32, i32) {
    %c0_i32 = arith.constant 0 : i32
    %c0_i32_0 = arith.constant 0 : i32
    %c0_i32_1 = arith.constant 0 : i32
    %c0_i32_2 = arith.constant 0 : i32
    return %arg0, %c0_i32, %c0_i32_0, %c0_i32_1 : i32, i32, i32, i32
  }
}

</mosaic_0001>

<bundles_post_ra>
// kernel: tpu_custom_call.1
= control target key start
LH: loop header
LB: loop body
LE: loop exit
PB: predicated region body
PF: predicated region fallthrough
CT: control target
= control target key end

     0   :  { %9 = vsyncpa [#allocation3], 0  ;;  %s1477_s0 = inlined_call_operand.vmem [shape: f32[2,16,32], index: 0, kind: input, shape index: {}]   ;;  %s1478_s1 = inlined_call_operand.vmem [shape: f32[2,16,1], index: 1, kind: input, shape index: {}]   ;;  %s1479_s2 = inlined_call_operand.hbm [shape: f32[2,32,512], index: 2, kind: input, shape index: {}]   ;;  %s1480_s3 = inlined_call_operand.hbm [shape: f32[2,32,256], index: 3, kind: input, shape index: {}]   ;;  %s1481_s4 = inlined_call_operand.hbm [shape: f32[2,2,16,512], index: 4, kind: output, shape index: {}]  }
   0x1   :  { %10 = vsyncpa [#allocation6], 0 }
   0x2   :  { %11 = vsyncpa [#allocation4], 0 }
   0x3   :  { %13 = vsyncpa [#allocation4 + $0x1], 0  ;;  %s1224_s15 = smov 0   ;;  %s1226_s16 = smov 0  }
   0x4   :  { %s1228_s17 = smov 0   ;;  %s1230_s18 = smov 0  }
   0x5 LB: > { %s1245_s19 = sadd.s32 4294967295, %s1184_s18   ;;  %s890_s20 = sadd.s32 4294967294, %s1184_s18   ;;  %s1184_s18 = sphi %s1230_s18, %s1500_s18   ;;  %s1180_s17 = sphi %s1228_s17, %s1499_s17   ;;  %s1176_s16 = sphi %s1226_s16, %s1498_s16   ;;  %s1172_s15 = sphi %s1224_s15, %s1497_s15  }
   0x6   : > { %s1249_s21 = sadd.s32 1, %s1184_s18   ;;  %s110_s22 = sadd.s32 1, %s1180_s17 }
   0x7   : > { %s107_s23 = ssub.s32 %s1184_s18, %s1249_s21  ;;  %p120_p0 = scmp.ne.s32.totalorder %s1180_s17, %s1176_s16 }
   0x8   : > { %p108_p1 = scmp.eq.s32.totalorder %s107_s23, 0  ;;  %p121_p2 = scmp.eq.s32.totalorder %s1245_s19, 1 }
   0x9   : > { %p126_p3 = scmp.ne.s32.totalorder %s1176_s16, %s1172_s15  ;;  %p127_p4 = scmp.eq.s32.totalorder %s890_s20, 1 }
   0xa   : > { %s1260_s24 = scalar_select %p108_p1, %s1180_s17, %s110_s22  }
   0xb   : > { %p1262_p5 = por %p121_p2, %p120_p0  ;;  %p1266_p6 = por %p127_p4, %p126_p3 }
   0xc   : > { %p891_p7 = scmp.ge.s32.totalorder %s1184_s18, 1  ;;  %p134_p8 = scmp.lt.s32.totalorder %s1184_s18, 3 }
   0xd   : > { %s1485_s25 = scalar_select %p1262_p5, 1, 0 }
   0xe   : > { %s1486_s26 = scalar_select %p1266_p6, 1, 0 }
   0xf   : > { %p1482_p10 = scmp.eq.s32.totalorder %s1245_s19, 0  ;;  %p1274_p11 = pnand %p891_p7, %p134_p8 }
  0x10   : > { %s1186_s28 = smov [#allocation2]   ;;  %s1187_s5 = smov [#allocation5]  }
  0x11   : > { %s1487_s27 = scalar_select %p1274_p11, 1, 0 }
  0x12   : > { %s152_s29 = sshll.u32 %s1186_s28, 4  ;;  %p996_p12 = pneg %p1274_p11  ;;  %s153_s29 = int_to_ptr.vmem [resolvable:$true] %s152_s29 }
  0x13   : > { %s165_s6 = sshll.u32 %s1187_s5, 4  ;;  %s1058_s9 = scalar_lea.hbm %s1479_s2, 4096  ;;  %s1286_s6 = int_to_ptr.vmem [resolvable:$true] %s165_s6 }
  0x14   : > { %p1282_p13 = pnand %p1482_p10, %p996_p12  ;;  %p1059_p0 = scmp.ne.s32.totalorder %s1479_s2, %s1058_s9 }
  0x15   : > { %p1065_p4 = scmp.lt.u32.totalorder %s1058_s9, %s1479_s2 }
  0x16   : > { %p1060_p1 = pneg %p1282_p13 }
  0x18   : > { %p1061_p2 = pnand %p1060_p1, %p1059_p0 }
  0x1a   : > { %p1062_p3 = pneg %p1061_p2 }
  0x1c   : > { %p1067_p7 = pnand %p1065_p4, %p1062_p3 }
  0x1e   : > { %1070 = shalt.err (!%p1067_p7)
}
  0x1f   : > { %s1071_s14 = scalar_lea.vmem %s153_s29, 4096  ;;  %p1079_p10 = scmp.lt.s32.totalorder %s153_s29, %s153_s29 }
  0x20   : > { %p1072_p8 = scmp.ne.s32.totalorder %s153_s29, %s1071_s14  ;;  %p1080_p6 = scmp.lt.s32.totalorder %s1071_s14, %s1071_s14 }
  0x22   : > { %p1074_p12 = pnand %p1072_p8, %p1060_p1  ;;  %p1081_p5 = por %p1080_p6, %p1079_p10 }
  0x24   : > { %p1075_p9 = pneg %p1074_p12 }
  0x26   : > { %p1082_p11 = pnand %p1081_p5, %p1075_p9 }
  0x28   : > { %1085 = shalt.err (!%p1082_p11)
}
  0x29   : > { %s1188_s20 = smov 512   ;;  %s1189_s22 = smov 32  }
  0x2a   : > { %999 = dma.hbm_to_vmem [thread:$0]  (!%p1282_p13), %s1479_s2, 4096, %s153_s29, [#allocation3], %s1188_s20, %s1188_s20, %s1189_s22  }
  0x2b   : > { %s1086_s8 = scalar_lea.hbm %s1480_s3, 2048 }
  0x2c   : > { %p1087_p0 = scmp.ne.s32.totalorder %s1480_s3, %s1086_s8  ;;  %p1093_p9 = scmp.lt.u32.totalorder %s1086_s8, %s1480_s3 }
  0x2e   : > { %p1089_p5 = pnand %p1087_p0, %p1060_p1 }
  0x30   : > { %p1090_p6 = pneg %p1089_p5 }
  0x32   : > { %p1095_p10 = pnand %p1093_p9, %p1090_p6 }
  0x34   : > { %1098 = shalt.err (!%p1095_p10)
}
  0x35   : > { %s1099_s29 = scalar_lea.vmem %s1286_s6, 2048  ;;  %p1107_p4 = scmp.lt.s32.totalorder %s1286_s6, %s1286_s6 }
  0x36   : > { %p1100_p11 = scmp.ne.s32.totalorder %s1286_s6, %s1099_s29  ;;  %p1108_p7 = scmp.lt.s32.totalorder %s1099_s29, %s1099_s29 }
  0x38   : > { %p1102_p2 = pnand %p1100_p11, %p1060_p1  ;;  %p1109_p8 = por %p1108_p7, %p1107_p4 }
  0x3a   : > { %p1103_p3 = pneg %p1102_p2 }
  0x3c   : > { %p1110_p12 = pnand %p1109_p8, %p1103_p3 }
  0x3e   : > { %1113 = shalt.err (!%p1110_p12)
}
  0x3f   : > { %s1190_s13 = smov 256   ;;  %s1191_s14 = smov 16  }
  0x40   : > { %1002 = dma.hbm_to_vmem [thread:$0]  (!%p1282_p13), %s1480_s3, 2048, %s1286_s6, [#allocation6], %s1190_s13, %s1190_s13, %s1191_s14  }
  0x41   : > { %p1489_p0 = scmp.ne.s32.totalorder %s1487_s27, 0 }
  0x42   : > { %p1490_p1 = scmp.eq.s32.totalorder (!%p1489_p0), %s1245_s19, 0 }
  0x43   : > { %181 = sbr.rel (%p1489_p0) target bundleno = 579 (0x243), region = 36 }
  0x4a   : > { %1159 = dma.done.wait (%p1490_p1), [#allocation3], 4096   ;;  %p1491_p5 = pmov %p1490_p1 }
  0x4b   : > { %p1492_p6 = pmov %p1490_p1 }
  0x4c   : > { %1161 = vsyncadd (%p1491_p5), [#allocation3], 4294963200 }
  0x4d   : > { %1163 = dma.done.wait (%p1492_p6), [#allocation6], 2048   ;;  %p1493_p9 = pmov %p1490_p1 }
  0x4e   : > { %s203_s30 = sand.u32 1, %s1176_s16   ;;  %p1494_p13 = scmp.ne.s32.totalorder %s1245_s19, 0 }
  0x4f   : > { %1165 = vsyncadd (%p1493_p9), [#allocation6], 4294965248  ;;  %s897_s6 = sshll.u32 %s203_s30, 7  ;;  %v215_v0 = vld [vmem:[#allocation2 + $0x8] sm:$0xff] (!%p1494_p13)  ;;  %v217_v2 = vld [vmem:[#allocation2 + $0x18] sm:$0xff] (!%p1494_p13)  ;;  %v1192_v7 = vmov (!%p1494_p13), 0.0  }
  0x50   : > { %s1348_s23 = scalar_lea.vmem [#allocation7], %s897_s6  ;;  %209 = sbr.rel (%p1494_p13) target bundleno = 320 (0x140), region = 48  ;;  %v219_v1 = vld [vmem:[#allocation2 + $0x28] sm:$0xff] (!%p1494_p13)  ;;  %v221_v4 = vld [vmem:[#allocation2 + $0x38] sm:$0xff] (!%p1494_p13)  ;;  %v214_v5 = vld [vmem:[#allocation2] sm:$0xff] (!%p1494_p13)  ;;  %311 = vmatprep.mubr.f32.mxu0 (!%p1494_p13), %v1192_v7  ;;  %388 = vmatprep.mubr.f32.mxu1 (!%p1494_p13), %v1192_v7  ;;  %v1193_v13 = vmov (!%p1494_p13), 0  }
  0x51   : > { %v938_v3 = vpack.c.bf16 (!%p1494_p13), %v219_v1, %v215_v0  ;;  %v218_v6 = vld [vmem:[#allocation2 + $0x20] sm:$0xff] (!%p1494_p13)  ;;  %v946_v8 = vpack.c.bf16 (!%p1494_p13), %v221_v4, %v217_v2  ;;  %v216_v10 = vld [vmem:[#allocation2 + $0x10] sm:$0xff] (!%p1494_p13)  ;;  %v223_v12 = vld [vmem:[#allocation2 + $0x48] sm:$0xff] (!%p1494_p13)  ;;  %1056 = vset.pattern.permute.xlu0 (!%p1494_p13), %v1193_v13  ;;  %vm240_vm0 = vcmask (!%p1494_p13), 261120  }
  0x52   : > { %v940_v9 = vpack.c.bf16 (!%p1494_p13), %v218_v6, %v214_v5  ;;  %v220_v11 = vld [vmem:[#allocation2 + $0x30] sm:$0xff] (!%p1494_p13)  ;;  %v227_v15 = vld [vmem:[#allocation2 + $0x68] sm:$0xff] (!%p1494_p13)  ;;  %v225_v16 = vld [vmem:[#allocation2 + $0x58] sm:$0xff] (!%p1494_p13) }
  0x53   : > { %939 = vmatprep.subr.bf16.mxu0 (!%p1494_p13), %v938_v3  ;;  %v948_v14 = vpack.c.bf16 (!%p1494_p13), %v220_v11, %v216_v10  ;;  %v229_v17 = vld [vmem:[#allocation2 + $0x78] sm:$0xff] (!%p1494_p13)  ;;  %947 = vmatprep.subr.bf16.mxu1 (!%p1494_p13), %v946_v8  ;;  %v942_v18 = vpack.c.bf16 (!%p1494_p13), %v227_v15, %v223_v12  ;;  %v222_v20 = vld [vmem:[#allocation2 + $0x40] sm:$0xff] (!%p1494_p13)  ;;  %v224_v22 = vld [vmem:[#allocation2 + $0x50] sm:$0xff] (!%p1494_p13) }
  0x54   : > { %941 = vmatpush1.bf16.msra.mxu0 (!%p1494_p13), %v940_v9  ;;  %v950_v19 = vpack.c.bf16 (!%p1494_p13), %v229_v17, %v225_v16  ;;  %v226_v21 = vld [vmem:[#allocation2 + $0x60] sm:$0xff] (!%p1494_p13)  ;;  %v228_v24 = vld [vmem:[#allocation2 + $0x70] sm:$0xff] (!%p1494_p13)  ;;  %v411_v25 = vld [vmem:[#allocation2 + $0x88] sm:$0xff] (!%p1494_p13) }
  0x55   : > { %949 = vmatpush1.bf16.msra.mxu1 (!%p1494_p13), %v948_v14  ;;  %v944_v23 = vpack.c.bf16 (!%p1494_p13), %v226_v21, %v222_v20  ;;  %943 = vmatprep.subr.bf16.mxu0 (!%p1494_p13), %v942_v18  ;;  %v952_v26 = vpack.c.bf16 (!%p1494_p13), %v228_v24, %v224_v22  ;;  %v415_v27 = vld [vmem:[#allocation2 + $0xa8] sm:$0xff] (!%p1494_p13)  ;;  %v413_v28 = vld [vmem:[#allocation2 + $0x98] sm:$0xff] (!%p1494_p13)  ;;  %v410_v32 = vld [vmem:[#allocation2 + $0x80] sm:$0xff] (!%p1494_p13) }
  0x56   : > { %951 = vmatprep.subr.bf16.mxu1 (!%p1494_p13), %v950_v19  ;;  %v417_v29 = vld [vmem:[#allocation2 + $0xb8] sm:$0xff] (!%p1494_p13)  ;;  %v954_v30 = vpack.c.bf16 (!%p1494_p13), %v415_v27, %v411_v25  ;;  %v414_v33 = vld [vmem:[#allocation2 + $0xa0] sm:$0xff] (!%p1494_p13)  ;;  %v412_v34 = vld [vmem:[#allocation2 + $0x90] sm:$0xff] (!%p1494_p13) }
  0x57   : > { %v962_v31 = vpack.c.bf16 %v417_v29, %v413_v28  ;;  %v210_v35 = vld [vmem:[%s1477_s0] sm:$0xff]  ;;  %v956_v36 = vpack.c.bf16 %v414_v33, %v410_v32  ;;  %v416_v37 = vld [vmem:[#allocation2 + $0xb0] sm:$0xff]  ;;  %v419_v38 = vld [vmem:[#allocation2 + $0xc8] sm:$0xff] }
  0x58   : > { %945 = vmatpush1.bf16.msra.mxu0 %v944_v23  ;;  %v964_v39 = vpack.c.bf16 %v416_v37, %v412_v34  ;;  %v423_v40 = vld [vmem:[#allocation2 + $0xe8] sm:$0xff]  ;;  %v421_v41 = vld [vmem:[#allocation2 + $0xd8] sm:$0xff]  ;;  %v418_v44 = vld [vmem:[#allocation2 + $0xc0] sm:$0xff] }
  0x59   : > { %953 = vmatpush1.bf16.msra.mxu1 %v952_v26  ;;  %955 = vmatprep.subr.bf16.mxu0 %v954_v30  ;;  %v425_v42 = vld [vmem:[#allocation2 + $0xf8] sm:$0xff]  ;;  %v958_v43 = vpack.c.bf16 %v423_v40, %v419_v38  ;;  %v422_v45 = vld [vmem:[#allocation2 + $0xe0] sm:$0xff]  ;;  %v420_v46 = vld [vmem:[#allocation2 + $0xd0] sm:$0xff] }
  0x5a   : > { %963 = vmatprep.subr.bf16.mxu1 %v962_v31  ;;  %v966_v47 = vpack.c.bf16 %v425_v42, %v421_v41  ;;  %v424_v48 = vld [vmem:[#allocation2 + $0xf0] sm:$0xff]  ;;  %v211_v49 = vld [vmem:[%s1477_s0 + $0x8] sm:$0xff]  ;;  %v960_v50 = vpack.c.bf16 %v422_v45, %v418_v44  ;;  %v212_v52 = vld [vmem:[%s1478_s1] sm:$0xff] }
  0x5b   : > { %899 = vmatmul.mubr.msk.f32.vlgmr.msra.gmra.mrb[0].mxu0 %vm240_vm0, %v210_v35  ;;  %v968_v51 = vpack.c.bf16 %v424_v48, %v420_v46  ;;  %232 = vperm.xlu0 %1056, %v212_v52   ;;  %v213_v53 = vld [vmem:[%s1478_s1 + $0x8] sm:$0xff] }
  0x5c   : > { %901 = vmatmul.mubr.msk.f32.vlgmr.msra.gmra.mrb[0].mxu1 %vm240_vm0, %v210_v35  ;;  %957 = vmatpush1.bf16.msra.mxu0 %v956_v36 }
  0x5d   : > { %965 = vmatpush1.bf16.msra.mxu1 %v964_v39  ;;  %317 = vmatprep.mubr.f32.mxu0 %v1192_v7 }
  0x5e   : > { %394 = vmatprep.mubr.f32.mxu1 %v1192_v7  ;;  %959 = vmatprep.subr.bf16.mxu0 %v958_v43 }
  0x5f   : > { %900 = vmatmul.mubr.msk.f32.gmra.mrb[2].mxu0 %vm240_vm0, %v211_v49  ;;  %967 = vmatprep.subr.bf16.mxu1 %v966_v47 }
  0x60   : > { %902 = vmatmul.mubr.msk.f32.gmra.mrb[2].mxu1 %vm240_vm0, %v211_v49  ;;  %961 = vmatpush1.bf16.msra.mxu0 %v960_v50 }
  0x61   : > { %969 = vmatpush1.bf16.msra.mxu1 %v968_v51  ;;  %490 = vmatprep.mubr.f32.mxu0 %v1192_v7 }
  0x62   : > { %567 = vmatprep.mubr.f32.mxu1 %v1192_v7  ;;  %237 = vperm.xlu0 %1056, %v213_v53  }
  0x63   : > { %903 = vmatmul.mubr.msk.f32.vlgmr.msra.gmra.mrb[4].mxu0 %vm240_vm0, %v210_v35 }
  0x64   : > { %905 = vmatmul.mubr.msk.f32.vlgmr.msra.gmra.mrb[4].mxu1 %vm240_vm0, %v210_v35  ;;  %496 = vmatprep.mubr.f32.mxu0 %v1192_v7 }
  0x65   : > { %573 = vmatprep.mubr.f32.mxu1 %v1192_v7 }
  0x67   : > { %904 = vmatmul.mubr.msk.f32.gmra.mrb[6].mxu0 %vm240_vm0, %v211_v49 }
  0x68   : > { %906 = vmatmul.mubr.msk.f32.gmra.mrb[6].mxu1 %vm240_vm0, %v211_v49 }
  0xda   : > { %v233_v54 = vpop.permute.xlu0 %232 }
  0xe1   : > { %v238_v62 = vpop.permute.xlu0 %237 }
 0x12e   : > { %v313_v55 = vpop.f32.mrb[0].mxu0 }
 0x12f   : > { %v390_v56 = vpop.f32.mrb[0].mxu1  ;;  %v314_v57 = vadd.f32 %v313_v55, %v233_v54  ;;  %v315_v58 = vpop.f32.mrb[1].mxu0 }
 0x130   : > { %v391_v59 = vadd.f32 %v390_v56, %v233_v54  ;;  %v316_v60 = vadd.f32 %v315_v58, %v233_v54  ;;  %v392_v61 = vpop.f32.mrb[1].mxu1 }
 0x131   : > { %401 = vst [vmem:[%s1348_s23] sm:$0xff] %v314_v57  ;;  %v393_v63 = vadd.f32 %v392_v61, %v233_v54 }
 0x132   : > { %403 = vst [vmem:[%s1348_s23 + $0x10] sm:$0xff] %v391_v59  ;;  %402 = vst [vmem:[%s1348_s23 + $0x8] sm:$0xff] %v316_v60  ;;  %v319_v0 = vpop.f32.mrb[2].mxu0 }
 0x133   : > { %404 = vst [vmem:[%s1348_s23 + $0x18] sm:$0xff] %v393_v63  ;;  %v396_v1 = vpop.f32.mrb[2].mxu1  ;;  %v320_v2 = vadd.f32 %v319_v0, %v238_v62  ;;  %v321_v3 = vpop.f32.mrb[3].mxu0 }
 0x134   : > { %v397_v4 = vadd.f32 %v396_v1, %v238_v62  ;;  %v322_v5 = vadd.f32 %v321_v3, %v238_v62  ;;  %v398_v6 = vpop.f32.mrb[3].mxu1 }
 0x135   : > { %405 = vst [vmem:[%s1348_s23 + $0x20] sm:$0xff] %v320_v2  ;;  %v399_v7 = vadd.f32 %v398_v6, %v238_v62 }
 0x136   : > { %407 = vst [vmem:[%s1348_s23 + $0x30] sm:$0xff] %v397_v4  ;;  %406 = vst [vmem:[%s1348_s23 + $0x28] sm:$0xff] %v322_v5  ;;  %v492_v8 = vpop.f32.mrb[4].mxu0 }
 0x137   : > { %408 = vst [vmem:[%s1348_s23 + $0x38] sm:$0xff] %v399_v7  ;;  %v493_v9 = vadd.f32 %v492_v8, %v233_v54  ;;  %v569_v10 = vpop.f32.mrb[4].mxu1  ;;  %v494_v11 = vpop.f32.mrb[5].mxu0 }
 0x138   : > { %v570_v12 = vadd.f32 %v569_v10, %v233_v54  ;;  %v495_v13 = vadd.f32 %v494_v11, %v233_v54  ;;  %v571_v14 = vpop.f32.mrb[5].mxu1 }
 0x139   : > { %907 = vst [vmem:[%s1348_s23 + $0x40] sm:$0xff] %v493_v9  ;;  %v572_v15 = vadd.f32 %v571_v14, %v233_v54 }
 0x13a   : > { %909 = vst [vmem:[%s1348_s23 + $0x50] sm:$0xff] %v570_v12  ;;  %908 = vst [vmem:[%s1348_s23 + $0x48] sm:$0xff] %v495_v13  ;;  %v498_v16 = vpop.f32.mrb[6].mxu0 }
 0x13b   : > { %910 = vst [vmem:[%s1348_s23 + $0x58] sm:$0xff] %v572_v15  ;;  %v499_v17 = vadd.f32 %v498_v16, %v238_v62  ;;  %v575_v18 = vpop.f32.mrb[6].mxu1  ;;  %v500_v19 = vpop.f32.mrb[7].mxu0 }
 0x13c   : > { %v576_v20 = vadd.f32 %v575_v18, %v238_v62  ;;  %v501_v21 = vadd.f32 %v500_v19, %v238_v62  ;;  %v577_v22 = vpop.f32.mrb[7].mxu1 }
 0x13d   : > { %911 = vst [vmem:[%s1348_s23 + $0x60] sm:$0xff] %v499_v17  ;;  %v578_v23 = vadd.f32 %v577_v22, %v238_v62 }
 0x13e   : > { %913 = vst [vmem:[%s1348_s23 + $0x70] sm:$0xff] %v576_v20  ;;  %912 = vst [vmem:[%s1348_s23 + $0x68] sm:$0xff] %v501_v21 }
 0x13f   : > { %914 = vst [vmem:[%s1348_s23 + $0x78] sm:$0xff] %v578_v23 }
 0x140 PF: > { %p915_p10 = scmp.ne.s32.totalorder %s1245_s19, 1 }
 0x141   : > { %v600_v24 = vld [vmem:[#allocation5 + $0x8] sm:$0xff] (!%p915_p10)  ;;  %v602_v25 = vld [vmem:[#allocation5 + $0x18] sm:$0xff] (!%p915_p10)  ;;  %v599_v29 = vld [vmem:[#allocation5] sm:$0xff] (!%p915_p10)  ;;  %v1194_v31 = vmov (!%p915_p10), 0.0   ;;  %v1195_v37 = vmov (!%p915_p10), 0   ;;  %vm617_vm1 = vcmask (!%p915_p10), 261120  }
 0x142   : > { %592 = sbr.rel (%p915_p10) target bundleno = 553 (0x229), region = 52  ;;  %v711_v26 = vld [vmem:[#allocation5 + $0x48] sm:$0xff] (!%p915_p10)  ;;  %v970_v27 = vpack.c.bf16 (!%p915_p10), %v602_v25, %v600_v24  ;;  %v713_v28 = vld [vmem:[#allocation5 + $0x58] sm:$0xff] (!%p915_p10)  ;;  %v601_v30 = vld [vmem:[#allocation5 + $0x10] sm:$0xff] (!%p915_p10)  ;;  %688 = vmatprep.mubr.f32.mxu0 (!%p915_p10), %v1194_v31  ;;  %705 = vst [vmem:[%s1348_s23 + $0x10] sm:$0xff] (!%p915_p10), %v1194_v31  ;;  %782 = vmatprep.mubr.f32.mxu1 (!%p915_p10), %v1194_v31 }
 0x143   : > { %706 = vst [vmem:[%s1348_s23 + $0x18] sm:$0xff] (!%p915_p10), %v1194_v31  ;;  %707 = vst [vmem:[%s1348_s23 + $0x30] sm:$0xff] (!%p915_p10), %v1194_v31  ;;  %v978_v32 = vpack.c.bf16 (!%p915_p10), %v713_v28, %v711_v26  ;;  %v972_v33 = vpack.c.bf16 (!%p915_p10), %v601_v30, %v599_v29  ;;  %v710_v34 = vld [vmem:[#allocation5 + $0x40] sm:$0xff] (!%p915_p10)  ;;  %v712_v35 = vld [vmem:[#allocation5 + $0x50] sm:$0xff] (!%p915_p10)  ;;  %1057 = vset.pattern.permute.xlu0 (!%p915_p10), %v1195_v37 }
 0x144   : > { %708 = vst [vmem:[%s1348_s23 + $0x38] sm:$0xff] (!%p915_p10), %v1194_v31  ;;  %928 = vst [vmem:[%s1348_s23 + $0x50] sm:$0xff] (!%p915_p10), %v1194_v31  ;;  %v604_v36 = vld [vmem:[#allocation5 + $0x28] sm:$0xff] (!%p915_p10)  ;;  %971 = vmatprep.subr.bf16.mxu0 (!%p915_p10), %v970_v27  ;;  %v980_v38 = vpack.c.bf16 (!%p915_p10), %v712_v35, %v710_v34  ;;  %v606_v39 = vld [vmem:[#allocation5 + $0x38] sm:$0xff] (!%p915_p10) }
 0x145   : > { %929 = vst [vmem:[%s1348_s23 + $0x58] sm:$0xff] (!%p915_p10), %v1194_v31  ;;  %930 = vst [vmem:[%s1348_s23 + $0x70] sm:$0xff] (!%p915_p10), %v1194_v31  ;;  %v715_v40 = vld [vmem:[#allocation5 + $0x68] sm:$0xff] (!%p915_p10)  ;;  %v717_v41 = vld [vmem:[#allocation5 + $0x78] sm:$0xff] (!%p915_p10)  ;;  %979 = vmatprep.subr.bf16.mxu1 (!%p915_p10), %v978_v32  ;;  %973 = vmatpush1.bf16.msra.mxu0 (!%p915_p10), %v972_v33  ;;  %v974_v42 = vpack.c.bf16 (!%p915_p10), %v606_v39, %v604_v36 }
 0x146   : > { %931 = vst [vmem:[%s1348_s23 + $0x78] sm:$0xff] (!%p915_p10), %v1194_v31  ;;  %v982_v43 = vpack.c.bf16 (!%p915_p10), %v717_v41, %v715_v40  ;;  %v603_v44 = vld [vmem:[#allocation5 + $0x20] sm:$0xff] (!%p915_p10)  ;;  %v605_v45 = vld [vmem:[#allocation5 + $0x30] sm:$0xff] (!%p915_p10)  ;;  %981 = vmatpush1.bf16.msra.mxu1 (!%p915_p10), %v980_v38  ;;  %v919_v52 = vld [vmem:[%s1478_s1 + $0x18] sm:$0xff] (!%p915_p10) }
 0x147   : > { %v714_v46 = vld [vmem:[#allocation5 + $0x60] sm:$0xff] (!%p915_p10)  ;;  %v976_v47 = vpack.c.bf16 (!%p915_p10), %v605_v45, %v603_v44  ;;  %v716_v48 = vld [vmem:[#allocation5 + $0x70] sm:$0xff] (!%p915_p10)  ;;  %975 = vmatprep.subr.bf16.mxu0 (!%p915_p10), %v974_v42  ;;  %v917_v53 = vld [vmem:[%s1477_s0 + $0x18] sm:$0xff] (!%p915_p10) }
 0x148   : > { %983 = vmatprep.subr.bf16.mxu1 (!%p915_p10), %v982_v43  ;;  %v984_v49 = vpack.c.bf16 (!%p915_p10), %v716_v48, %v714_v46  ;;  %v918_v50 = vld [vmem:[%s1478_s1 + $0x10] sm:$0xff] (!%p915_p10) }
 0x149   : > { %609 = vperm.xlu0 %1057, %v918_v50   ;;  %977 = vmatpush1.bf16.msra.mxu0 %v976_v47  ;;  %v916_v51 = vld [vmem:[%s1477_s0 + $0x10] sm:$0xff] }
 0x14a   : > { %985 = vmatpush1.bf16.msra.mxu1 %v984_v49 }
 0x14c   : > { %920 = vmatmul.mubr.msk.f32.vlgmr.msra.gmra.mrb[0].mxu0 %vm617_vm1, %v916_v51 }
 0x14d   : > { %614 = vperm.xlu0 %1057, %v919_v52   ;;  %922 = vmatmul.mubr.msk.f32.vlgmr.msra.gmra.mrb[0].mxu1 %vm617_vm1, %v916_v51 }
 0x14e   : > { %694 = vmatprep.mubr.f32.mxu0 %v1194_v31  ;;  %788 = vmatprep.mubr.f32.mxu1 %v1194_v31 }
 0x150   : > { %921 = vmatmul.mubr.msk.f32.gmra.mrb[2].mxu0 %vm617_vm1, %v917_v53 }
 0x151   : > { %923 = vmatmul.mubr.msk.f32.gmra.mrb[2].mxu1 %vm617_vm1, %v917_v53 }
 0x1c8   : > { %v610_v54 = vpop.permute.xlu0 %609 }
 0x1cc   : > { %v615_v63 = vpop.permute.xlu0 %614 }
 0x21f   : > { %v690_v55 = vpop.f32.mrb[0].mxu0 }
 0x220   : > { %v691_v56 = vadd.f32 %v690_v55, %v610_v54  ;;  %v784_v57 = vpop.f32.mrb[0].mxu1  ;;  %v692_v58 = vpop.f32.mrb[1].mxu0 }
 0x221   : > { %v785_v59 = vadd.f32 %v784_v57, %v610_v54  ;;  %v693_v60 = vadd.f32 %v692_v58, %v610_v54  ;;  %v786_v61 = vpop.f32.mrb[1].mxu1 }
 0x222   : > { %701 = vst [vmem:[%s1348_s23] sm:$0xff] %v691_v56  ;;  %v787_v62 = vadd.f32 %v786_v61, %v610_v54 }
 0x223   : > { %924 = vst [vmem:[%s1348_s23 + $0x40] sm:$0xff] %v785_v59  ;;  %702 = vst [vmem:[%s1348_s23 + $0x8] sm:$0xff] %v693_v60  ;;  %v696_v0 = vpop.f32.mrb[2].mxu0 }
 0x224   : > { %925 = vst [vmem:[%s1348_s23 + $0x48] sm:$0xff] %v787_v62  ;;  %v697_v1 = vadd.f32 %v696_v0, %v615_v63  ;;  %v790_v2 = vpop.f32.mrb[2].mxu1  ;;  %v698_v3 = vpop.f32.mrb[3].mxu0 }
 0x225   : > { %v791_v4 = vadd.f32 %v790_v2, %v615_v63  ;;  %v699_v5 = vadd.f32 %v698_v3, %v615_v63  ;;  %v792_v6 = vpop.f32.mrb[3].mxu1 }
 0x226   : > { %703 = vst [vmem:[%s1348_s23 + $0x20] sm:$0xff] %v697_v1  ;;  %v793_v7 = vadd.f32 %v792_v6, %v615_v63 }
 0x227   : > { %926 = vst [vmem:[%s1348_s23 + $0x60] sm:$0xff] %v791_v4  ;;  %704 = vst [vmem:[%s1348_s23 + $0x28] sm:$0xff] %v699_v5 }
 0x228   : > { %927 = vst [vmem:[%s1348_s23 + $0x68] sm:$0xff] %v793_v7 }
 0x229 PF: > { %s937_s28 = sshll.u32 %s1245_s19, 11  ;;  %s818_s9 = sshll.u32 %s1348_s23, 4  ;;  %s1432_s9 = int_to_ptr.vmem [resolvable:$true] %s818_s9 }
 0x22a   : > { %s1429_s8 = scalar_lea.hbm %s1481_s4, %s937_s28  ;;  %s1436_s10 = scalar_lea.sflag [#allocation4], %s203_s30 }
 0x22b   : > { %s1114_s11 = scalar_lea.vmem %s1432_s9, 2048  ;;  %p1495_p2 = scmp.ne.s32.totalorder %s1485_s25, 0 }
 0x22c   : > { %p1115_p11 = scmp.ne.s32.totalorder %s1432_s9, %s1114_s11  ;;  %s1196_s19 = smov [#allocation7]  }
 0x22d   : > { %s1118_s12 = sshll.u32 %s1196_s19, 4  ;;  %s1119_s12 = int_to_ptr.vmem [resolvable:$false] %s1118_s12 }
 0x22e   : > { %p1116_p3 = pnand %p1115_p11, %p1495_p2  ;;  %s1120_s29 = scalar_lea.vmem %s1119_s12, 4096 }
 0x22f   : > { %p1121_p7 = scmp.lt.s32.totalorder %s1432_s9, %s1119_s12  ;;  %p1122_p8 = scmp.lt.s32.totalorder %s1120_s29, %s1114_s11 }
 0x230   : > { %p1117_p4 = pneg %p1116_p3 }
 0x231   : > { %p1123_p12 = por %p1122_p8, %p1121_p7 }
 0x233   : > { %p1124_p0 = pnand %p1123_p12, %p1117_p4 }
 0x235   : > { %1127 = shalt.err (!%p1124_p0)
}
 0x236   : > { %s1128_s30 = scalar_lea.hbm %s1429_s8, 2048  ;;  %s1132_s14 = scalar_lea.hbm %s1481_s4, 4096 }
 0x237   : > { %p1129_p1 = scmp.ne.s32.totalorder %s1429_s8, %s1128_s30  ;;  %p1133_p9 = scmp.lt.u32.totalorder %s1429_s8, %s1481_s4 }
 0x238   : > { %p1134_p13 = scmp.lt.u32.totalorder %s1132_s14, %s1128_s30  ;;  %p1136_p11 = scmp.lt.u32.totalorder %s1128_s30, %s1429_s8 }
 0x239   : > { %p1130_p5 = pnand %p1129_p1, %p1495_p2 }
 0x23a   : > { %p1135_p10 = por %p1134_p13, %p1133_p9 }
 0x23b   : > { %p1131_p6 = pneg %p1130_p5 }
 0x23c   : > { %p1137_p3 = por %p1136_p11, %p1135_p10 }
 0x23e   : > { %p1138_p4 = pnand %p1137_p3, %p1131_p6 }
 0x240   : > { %1141 = shalt.err (!%p1138_p4)
}
 0x241   : > { %s1197_s6 = smov 512   ;;  %s1198_s27 = smov 32  }
 0x242   : > { %994 = dma.vmem_to_hbm [thread:$0]  (%p1495_p2), %s1432_s9, 2048, %s1429_s8, %s1436_s10, %s1197_s6, %s1197_s6, %s1198_s27  }
 0x243 PF: > { %p1011_p7 = scmp.ge.s32.totalorder %s1184_s18, 2  ;;  %s833_s28 = sand.u32 1, %s1172_s15  }
 0x244   : > { %p1496_p8 = scmp.ne.s32.totalorder %s1486_s26, 0  ;;  %s834_s5 = scalar_lea.sflag [#allocation4], %s833_s28 }
 0x246   : > { %p1004_p12 = pnand %p1011_p7, %p1496_p8 }
 0x248   : > { %1167 = dma.done.wait (!%p1004_p12), %s834_s5, 2048  }
 0x249   : > { %1169 = vsyncadd (!%p1004_p12), %s834_s5, 4294965248  ;;  %p16_p0 = scmp.ge.s32.totalorder %s1249_s21, 4   ;;  %s1497_s15 = smov %s1176_s16 }
 0x24a   : > { %s1498_s16 = smov %s1180_s17  ;;  %s1499_s17 = smov %s1260_s24 }
 0x24b   : > { %s1500_s18 = smov %s1249_s21  ;;  %18 = sbr.rel (!%p16_p0) target bundleno = 5 (0x5), region = 91 }
 0x252   :  { %839 = vsyncpa [#allocation3], 1 }
 0x253   :  { %841 = vsyncpa [#allocation3 + $0x1], 1 }
 0x254   :  { %842 = vsyncpa [#allocation6], 1 }
 0x255   :  { %843 = vsyncpa [#allocation4], 1 }
 0x256   :  { %845 = vsyncpa [#allocation4 + $0x1], 1 }

</bundles_post_ra>
